<compile_context>
chip_gen: v7x
topology: tpu7x:2x2x1
jax: 0.10.0
libtpu: 0.0.40
codegen_flags: <defaults>
</compile_context>

<pallas_src>
import math

import jax
import jax.numpy as jnp
from jax.experimental import pallas as pl
from jax.experimental.pallas import tpu as pltpu


def _sum_y_kernel(x_ref, scale_ref, shift_ref, o_ref):
    """x_ref: (TB, 2*N) block, scale/shift: (1, N), o_ref: (TB, N)."""
    n = o_ref.shape[-1]
    a = x_ref[:, :n].astype(jnp.float32)   # first channel-half (flattened)
    b = x_ref[:, n:].astype(jnp.float32)   # second channel-half (flattened)
    y = a + b
    o_ref[...] = (y * scale_ref[...] + shift_ref[...]).astype(o_ref.dtype)


def _pick_tile_rows(batch, row_bytes, target_bytes=4 * 1024 * 1024):
    """Rows per grid step: ~target_bytes per input tile, multiple of 8."""
    tb = max(1, target_bytes // max(row_bytes, 1))
    if batch <= tb or batch <= 8:
        return batch                      # single block along rows (== full dim)
    return max(8, (tb // 8) * 8)          # (8,128)-compatible, cdiv grid pads tail


def sum_y(x, gamma, beta, running_mean, running_var, eps=1e-5, tile_rows=None):
    """Fused SumY forward: add channel halves + BatchNorm (eval) + flatten.

    x: (B, 2C, H, W) or (B, 2C) or (B, 2C, L).  Returns (B, C * prod(rest)).
    """
    batch = x.shape[0]
    c2 = x.shape[1]
    assert c2 % 2 == 0, "channel dim must be even (braid form has 2*channel_in)"
    c = c2 // 2
    spatial = int(math.prod(x.shape[2:])) if x.ndim > 2 else 1
    n = c * spatial                        # output row width (lane dim)

    # Free reshapes / tiny O(C) precompute in plain JAX.
    x2d = x.reshape(batch, 2 * n)
    scale = (gamma.astype(jnp.float32)
             / jnp.sqrt(running_var.astype(jnp.float32) + eps))
    shift = beta.astype(jnp.float32) - running_mean.astype(jnp.float32) * scale
    scale_row = jnp.repeat(scale, spatial).reshape(1, n)
    shift_row = jnp.repeat(shift, spatial).reshape(1, n)

    row_bytes = 2 * n * x.dtype.itemsize
    tb = tile_rows if tile_rows is not None else _pick_tile_rows(batch, row_bytes)

    grid_spec = pltpu.PrefetchScalarGridSpec(
        num_scalar_prefetch=0,
        grid=(pl.cdiv(batch, tb),),
        in_specs=[
            pl.BlockSpec((tb, 2 * n), lambda i: (i, 0)),   # x rows (both halves)
            pl.BlockSpec((1, n), lambda i: (0, 0)),        # folded BN scale
            pl.BlockSpec((1, n), lambda i: (0, 0)),        # folded BN shift
        ],
        out_specs=pl.BlockSpec((tb, n), lambda i: (i, 0)),
    )

    out_bytes = batch * n * x.dtype.itemsize
    return pl.pallas_call(
        _sum_y_kernel,
        out_shape=jax.ShapeDtypeStruct((batch, n), x.dtype),
        grid_spec=grid_spec,
        compiler_params=pltpu.CompilerParams(
            dimension_semantics=("parallel",),
            vmem_limit_bytes=32 * 1024 * 1024,
        ),
        cost_estimate=pl.CostEstimate(
            flops=3 * batch * n,           # add + fused mul-add per output elem
            transcendentals=0,
            bytes_accessed=x2d.size * x.dtype.itemsize + out_bytes + 8 * n,
        ),
    )(x2d, scale_row, shift_row)


def sum_y_reference(x, gamma, beta, running_mean, running_var, eps=1e-5):
    """Pure-jnp mirror of SumY.forward in eval mode."""
    c = x.shape[1] // 2
    a, b = jnp.split(x, 2, axis=1)
    y = a + b
    bshape = (1, c) + (1,) * (y.ndim - 2)
    y = (y - running_mean.reshape(bshape)) / jnp.sqrt(running_var.reshape(bshape) + eps)
    y = y * gamma.reshape(bshape) + beta.reshape(bshape)
    return y.reshape(y.shape[0], -1)


if __name__ == "__main__":
    key = jax.random.PRNGKey(0)
    kx, kg, kb, km, kv, kx2 = jax.random.split(key, 6)

    # channel_in = 4  ->  braid input has 2*channel_in = 8 channels.
    B, C, H, W = 2, 4, 16, 16
    x = jax.random.normal(kx, (B, 2 * C, H, W), dtype=jnp.float32)
    gamma = 1.0 + 0.1 * jax.random.normal(kg, (C,), dtype=jnp.float32)
    beta = 0.1 * jax.random.normal(kb, (C,), dtype=jnp.float32)
    running_mean = 0.1 * jax.random.normal(km, (C,), dtype=jnp.float32)
    running_var = jax.random.uniform(kv, (C,), dtype=jnp.float32,
                                     minval=0.5, maxval=1.5)

    out = jax.block_until_ready(sum_y(x, gamma, beta, running_mean, running_var))
    assert out.shape == (B, C * H * W), out.shape
    ref = sum_y_reference(x, gamma, beta, running_mean, running_var)
    assert jnp.allclose(out, ref, atol=1e-4, rtol=1e-4), "mismatch vs reference"

    # Larger batch, forced multi-step row-tiled grid (tile_rows=8 -> grid (2,)).
    B2 = 16
    x2 = jax.random.normal(kx2, (B2, 2 * C, H, W), dtype=jnp.float32)
    out2 = jax.block_until_ready(
        sum_y(x2, gamma, beta, running_mean, running_var, tile_rows=8))
    ref2 = sum_y_reference(x2, gamma, beta, running_mean, running_var)
    assert out2.shape == (B2, C * H * W), out2.shape
    assert jnp.allclose(out2, ref2, atol=1e-4, rtol=1e-4), "mismatch (tiled grid)"

    print("KERNEL_OK")
</pallas_src>

<mosaic_0001>
module attributes {stable_mosaic.version = 11 : i64} {
  func.func @_sum_y_kernel(%arg0: i32, %arg1: memref<2x2048xf32, #tpu.memory_space<vmem>>, %arg2: memref<1x1024xf32, #tpu.memory_space<vmem>>, %arg3: memref<1x1024xf32, #tpu.memory_space<vmem>>, %arg4: memref<2x1024xf32, #tpu.memory_space<vmem>>) attributes {dimension_semantics = [#tpu.dimension_semantics<parallel>], iteration_bounds = array<i64: 1>, scalar_prefetch = 0 : i64, scratch_operands = 0 : i64, tpu.core_type = #tpu.core_type<tc>, window_params = [{transform_indices = @transform_0, window_bounds = array<i64: 2, 2048>}, {pipeline_mode = #tpu.pipeline_mode<synchronous>, transform_indices = @transform_1, window_bounds = array<i64: 1, 1024>}, {pipeline_mode = #tpu.pipeline_mode<synchronous>, transform_indices = @transform_2, window_bounds = array<i64: 1, 1024>}, {transform_indices = @transform_3, window_bounds = array<i64: 2, 1024>}]} {
    %c0 = arith.constant 0 : index
    %c0_0 = arith.constant 0 : index
    %0 = vector.load %arg1[%c0, %c0_0] : memref<2x2048xf32, #tpu.memory_space<vmem>>, vector<2x1024xf32>
    %c0_1 = arith.constant 0 : index
    %c1024 = arith.constant 1024 : index
    %1 = vector.load %arg1[%c0_1, %c1024] : memref<2x2048xf32, #tpu.memory_space<vmem>>, vector<2x1024xf32>
    %2 = arith.addf %0, %1 : vector<2x1024xf32>
    %c0_2 = arith.constant 0 : index
    %c0_3 = arith.constant 0 : index
    %3 = vector.load %arg2[%c0_2, %c0_3] : memref<1x1024xf32, #tpu.memory_space<vmem>>, vector<1x1024xf32>
    %4 = vector.broadcast %3 : vector<1x1024xf32> to vector<2x1024xf32>
    %5 = arith.mulf %2, %4 : vector<2x1024xf32>
    %c0_4 = arith.constant 0 : index
    %c0_5 = arith.constant 0 : index
    %6 = vector.load %arg3[%c0_4, %c0_5] : memref<1x1024xf32, #tpu.memory_space<vmem>>, vector<1x1024xf32>
    %7 = vector.broadcast %6 : vector<1x1024xf32> to vector<2x1024xf32>
    %8 = arith.addf %5, %7 : vector<2x1024xf32>
    %c0_6 = arith.constant 0 : index
    %c0_7 = arith.constant 0 : index
    %9 = vector.load %arg4[%c0_6, %c0_7] : memref<2x1024xf32, #tpu.memory_space<vmem>>, vector<2x1024xf32>
    tpu.vector_store %arg4[%c0_6, %c0_7], %8 {strides = array<i32>} : memref<2x1024xf32, #tpu.memory_space<vmem>>, vector<2x1024xf32>,
    return
  }
  func.func @transform_0(%arg0: i32) -> (i32, i32) {
    %c0_i32 = arith.constant 0 : i32
    %c0_i32_0 = arith.constant 0 : i32
    return %arg0, %c0_i32 : i32, i32
  }
  func.func @transform_1(%arg0: i32) -> (i32, i32) {
    %c0_i32 = arith.constant 0 : i32
    %c0_i32_0 = arith.constant 0 : i32
    %c0_i32_1 = arith.constant 0 : i32
    return %c0_i32, %c0_i32_0 : i32, i32
  }
  func.func @transform_2(%arg0: i32) -> (i32, i32) {
    %c0_i32 = arith.constant 0 : i32
    %c0_i32_0 = arith.constant 0 : i32
    %c0_i32_1 = arith.constant 0 : i32
    return %c0_i32, %c0_i32_0 : i32, i32
  }
  func.func @transform_3(%arg0: i32) -> (i32, i32) {
    %c0_i32 = arith.constant 0 : i32
    %c0_i32_0 = arith.constant 0 : i32
    return %arg0, %c0_i32 : i32, i32
  }
}

</mosaic_0001>

<bundles_post_ra>
// kernel: tpu_custom_call.1
= control target key start
LH: loop header
LB: loop body
LE: loop exit
PB: predicated region body
PF: predicated region fallthrough
CT: control target
= control target key end

     0   :  { %8 = vsyncpa [#allocation3], 0  ;;  %s390_s0 = inlined_call_operand.hbm [shape: f32[2,2048], index: 0, kind: input, shape index: {}]   ;;  %s391_s1 = inlined_call_operand.hbm [shape: f32[1,1024], index: 1, kind: input, shape index: {}]   ;;  %s392_s2 = inlined_call_operand.hbm [shape: f32[1,1024], index: 2, kind: input, shape index: {}]   ;;  %s393_s3 = inlined_call_operand.hbm [shape: f32[2,1024], index: 3, kind: output, shape index: {}]  }
   0x1   :  { %9 = vsyncpa [#allocation6], 0 }
   0x2   :  { %10 = vsyncpa [#allocation4], 0  ;;  %s317_s12 = smov [#allocation5]   ;;  %s318_s14 = smov [#allocation2]  }
   0x3   :  { %s27_s13 = sshll.u32 %s317_s12, 4  ;;  %s17_s15 = sshll.u32 %s318_s14, 4  ;;  %s28_s13 = int_to_ptr.vmem [resolvable:$true] %s27_s13  ;;  %s18_s15 = int_to_ptr.vmem [resolvable:$true] %s17_s15 }
   0x4   :  { %s223_s18 = scalar_lea.hbm %s391_s1, 128 }
   0x5   :  { %p224_p0 = scmp.ne.s32.totalorder %s391_s1, %s223_s18  ;;  %p227_p1 = scmp.lt.u32.totalorder %s223_s18, %s391_s1 }
   0x7   :  { %p229_p2 = pnand %p227_p1, %p224_p0 }
   0x9   :  { %232 = shalt.err (!%p229_p2)
}
   0xa   :  { %s233_s23 = scalar_lea.vmem %s28_s13, 128  ;;  %p238_p4 = scmp.lt.s32.totalorder %s28_s13, %s28_s13 }
   0xb   :  { %p234_p3 = scmp.ne.s32.totalorder %s28_s13, %s233_s23  ;;  %p239_p5 = scmp.lt.s32.totalorder %s233_s23, %s233_s23 }
   0xd   :  { %p240_p6 = por %p239_p5, %p238_p4 }
   0xf   :  { %p241_p7 = pnand %p240_p6, %p234_p3 }
  0x11   :  { %244 = shalt.err (!%p241_p7)
}
  0x12   :  { %30 = dma.hbm_to_vmem [thread:$0]  %s391_s1, 128, %s28_s13, [#allocation6]  }
  0x13   :  { %s245_s28 = scalar_lea.hbm %s390_s0, 512 }
  0x14   :  { %p246_p8 = scmp.ne.s32.totalorder %s390_s0, %s245_s28  ;;  %p249_p9 = scmp.lt.u32.totalorder %s245_s28, %s390_s0 }
  0x16   :  { %p251_p10 = pnand %p249_p9, %p246_p8 }
  0x18   :  { %254 = shalt.err (!%p251_p10)
}
  0x19   :  { %s255_s6 = scalar_lea.vmem %s18_s15, 512  ;;  %p260_p12 = scmp.lt.s32.totalorder %s18_s15, %s18_s15 }
  0x1a   :  { %p256_p11 = scmp.ne.s32.totalorder %s18_s15, %s255_s6  ;;  %p261_p13 = scmp.lt.s32.totalorder %s255_s6, %s255_s6 }
  0x1c   :  { %p262_p0 = por %p261_p13, %p260_p12 }
  0x1e   :  { %p263_p1 = pnand %p262_p0, %p256_p11 }
  0x20   :  { %266 = shalt.err (!%p263_p1)
}
  0x21   :  { %20 = dma.hbm_to_vmem [thread:$0]  %s390_s0, 512, %s18_s15, [#allocation3]  }
  0x22   :  { %s319_s8 = smov [#allocation7]   ;;  %s267_s12 = scalar_lea.hbm %s392_s2, 128 }
  0x23   :  { %s37_s9 = sshll.u32 %s319_s8, 4  ;;  %p268_p2 = scmp.ne.s32.totalorder %s392_s2, %s267_s12  ;;  %s38_s9 = int_to_ptr.vmem [resolvable:$true] %s37_s9 }
  0x24   :  { %p271_p3 = scmp.lt.u32.totalorder %s267_s12, %s392_s2 }
  0x26   :  { %p273_p4 = pnand %p271_p3, %p268_p2 }
  0x28   :  { %276 = shalt.err (!%p273_p4)
}
  0x29   :  { %s277_s18 = scalar_lea.vmem %s38_s9, 128  ;;  %p282_p6 = scmp.lt.s32.totalorder %s38_s9, %s38_s9 }
  0x2a   :  { %p278_p5 = scmp.ne.s32.totalorder %s38_s9, %s277_s18  ;;  %p283_p7 = scmp.lt.s32.totalorder %s277_s18, %s277_s18 }
  0x2c   :  { %p284_p8 = por %p283_p7, %p282_p6 }
  0x2e   :  { %p285_p9 = pnand %p284_p8, %p278_p5 }
  0x30   :  { %288 = shalt.err (!%p285_p9)
}
  0x31   :  { %40 = dma.hbm_to_vmem [thread:$0]  %s392_s2, 128, %s38_s9, [#allocation6]  }
  0x32   :  { %311 = dma.done.wait [#allocation3], 512  }
  0x33   :  { %312 = vsyncadd [#allocation3], 4294966784 }
  0x34   :  { %313 = dma.done.wait [#allocation6], 256  }
  0x35   :  { %314 = vsyncadd [#allocation6], 4294967040  ;;  %v58_v0 = vlaneseq  ;;  %v320_v1 = vmov 1983009808   ;;  %v50_v10 = vld [vmem:[#allocation2] sm:$0xff]  ;;  %v52_v11 = vld [vmem:[#allocation2 + $0x10] sm:$0xff] }
  0x36   :  { %v93_v2 = vunpack.c.l.s4 %v320_v1  ;;  %v56_v12 = vld [vmem:[#allocation5] sm:$0xff]  ;;  %v128_v19 = vld [vmem:[#allocation7] sm:$0xff]  ;;  %v54_v25 = vadd.f32 %v52_v11, %v50_v10  ;;  %v53_v40 = vld [vmem:[#allocation2 + $0x18] sm:$0xff]  ;;  %s321_s2 = smov [#allocation8]  }
  0x37   :  { %v59_v3 = vshrl.u32 %v58_v0, 7  ;;  %v51_v39 = vld [vmem:[#allocation2 + $0x8] sm:$0xff]  ;;  %s208_s19 = sshll.u32 %s321_s2, 4  ;;  %s209_s19 = int_to_ptr.vmem [resolvable:$true] %s208_s19 }
  0x38   :  { %v94_v4 = vunpack.c.0.s8 %v93_v2  ;;  %v55_v51 = vadd.f32 %v53_v40, %v51_v39  ;;  %s289_s20 = scalar_lea.vmem %s209_s19, 256  ;;  %p294_p11 = scmp.lt.s32.totalorder %s209_s19, %s209_s19 }
  0x39   :  { %v60_v5 = vsub.s32 0, %v59_v3  ;;  %v64_v6 = vsub.s32 1, %v59_v3  ;;  %v68_v7 = vsub.s32 2, %v59_v3  ;;  %v72_v8 = vsub.s32 3, %v59_v3  ;;  %p290_p10 = scmp.ne.s32.totalorder %s209_s19, %s289_s20  ;;  %p295_p12 = scmp.lt.s32.totalorder %s289_s20, %s289_s20 }
  0x3a   :  { %v76_v9 = vsub.s32 4, %v59_v3  ;;  %v97_v13 = vsub.s32 %v94_v4, %v59_v3  ;;  %v80_v14 = vsub.s32 5, %v59_v3  ;;  %v84_v15 = vsub.s32 6, %v59_v3 }
  0x3b   :  { %v61_v16 = vrot.slane %v56_v12, %v60_v5  ;;  %v65_v17 = vrot.slane %v56_v12, %v64_v6  ;;  %v69_v18 = vrot.slane %v56_v12, %v68_v7  ;;  %v88_v20 = vsub.s32 7, %v59_v3  ;;  %p296_p13 = por %p295_p12, %p294_p11 }
  0x3c   :  { %v73_v21 = vrot.slane %v56_v12, %v72_v8  ;;  %v133_v22 = vrot.slane %v128_v19, %v60_v5  ;;  %v137_v23 = vrot.slane %v128_v19, %v64_v6  ;;  %v141_v24 = vrot.slane %v128_v19, %v68_v7 }
  0x3d   :  { %v90_v26 = vcombine.low %v61_v16, %v65_v17  ;;  %v145_v27 = vrot.slane %v128_v19, %v72_v8  ;;  %v77_v28 = vrot.slane %v56_v12, %v76_v9  ;;  %v81_v31 = vrot.slane %v56_v12, %v80_v14  ;;  %p297_p0 = pnand %p296_p13, %p290_p10 }
  0x3e   :  { %v91_v29 = vcombine.low %v69_v18, %v73_v21  ;;  %v162_v30 = vcombine.low %v133_v22, %v137_v23  ;;  %v85_v32 = vrot.slane %v56_v12, %v84_v15  ;;  %v89_v35 = vrot.slane %v56_v12, %v88_v20 }
  0x3f   :  { %v98_v33 = vrot.slane %v90_v26, %v97_v13  ;;  %v163_v34 = vcombine.low %v141_v24, %v145_v27  ;;  %v149_v36 = vrot.slane %v128_v19, %v76_v9  ;;  %v107_v41 = vcombine.low %v77_v28, %v81_v31 }
  0x40   :  { %v105_v37 = vrot.slane %v91_v29, %v97_v13  ;;  %v170_v38 = vrot.slane %v162_v30, %v97_v13  ;;  %v153_v42 = vrot.slane %v128_v19, %v80_v14  ;;  %v108_v44 = vcombine.low %v85_v32, %v89_v35 }
  0x41   :  { %v177_v43 = vrot.slane %v163_v34, %v97_v13  ;;  %v157_v45 = vrot.slane %v128_v19, %v84_v15  ;;  %v161_v46 = vrot.slane %v128_v19, %v88_v20  ;;  %v115_v48 = vrot.slane %v107_v41, %v97_v13 }
  0x42   :  { %v106_v47 = vcombine.low %v98_v33, %v105_v37  ;;  %v179_v49 = vcombine.low %v149_v36, %v153_v42  ;;  %v122_v52 = vrot.slane %v108_v44, %v97_v13 }
  0x43   :  { %v178_v50 = vcombine.low %v170_v38, %v177_v43  ;;  %v180_v53 = vcombine.low %v157_v45, %v161_v46 }
  0x44   :  { %v126_v54 = vmul.f32 %v106_v47, %v54_v25  ;;  %v187_v55 = vrot.slane %v179_v49, %v97_v13  ;;  %v123_v56 = vcombine.low %v115_v48, %v122_v52 }
  0x45   :  { %v194_v57 = vrot.slane %v180_v53, %v97_v13 }
  0x46   :  { %v198_v58 = vadd.f32 %v178_v50, %v126_v54  ;;  %v127_v59 = vmul.f32 %v123_v56, %v55_v51 }
  0x47   :  { %v195_v60 = vcombine.low %v187_v55, %v194_v57 }
  0x48   :  { %200 = vst [vmem:[#allocation8] sm:$0xff] %v198_v58 }
  0x49   :  { %v199_v61 = vadd.f32 %v195_v60, %v127_v59 }
  0x4b   :  { %201 = vst [vmem:[#allocation8 + $0x8] sm:$0xff] %v199_v61 }
  0x4c   :  { %300 = shalt.err (!%p297_p0)
}
  0x4d   :  { %s301_s23 = scalar_lea.hbm %s393_s3, 256 }
  0x4e   :  { %p302_p1 = scmp.ne.s32.totalorder %s393_s3, %s301_s23  ;;  %p305_p2 = scmp.lt.u32.totalorder %s301_s23, %s393_s3 }
  0x50   :  { %p307_p3 = pnand %p305_p2, %p302_p1 }
  0x52   :  { %310 = shalt.err (!%p307_p3)
}
  0x53   :  { %211 = dma.vmem_to_hbm [thread:$0]  %s209_s19, 256, %s393_s3, [#allocation4]  }
  0x54   :  { %315 = dma.done.wait [#allocation4], 256  }
  0x55   :  { %316 = vsyncadd [#allocation4], 4294967040 }
  0x56   :  { %215 = vsyncpa [#allocation3], 1 }
  0x57   :  { %216 = vsyncpa [#allocation6], 1 }
  0x58   :  { %217 = vsyncpa [#allocation4], 1 }

</bundles_post_ra>
